<compile_context>
chip_gen: v6e
topology: v6e:2x2x1
jax: 0.10.0
libtpu: 0.0.40
codegen_flags: <defaults>
</compile_context>

<pallas_src>
import functools
import math

import jax
import jax.numpy as jnp
import numpy as np
from jax import lax
from jax.experimental import pallas as pl
from jax.experimental.pallas import tpu as pltpu

TILE_E = 512          # edge-tile size for the fused attention/layer kernel
TILE_N_POOL = 512     # node-tile size for the global pooling kernel
LANE = 128
NEG = -1e30           # plain Python float (becomes a jaxpr literal; np/jnp scalars would
                      # be captured as constants and break pallas tracing)


def _round_up(x, m):
    return ((x + m - 1) // m) * m


# --------------------------- generic row-tiled linear ---------------------------

def _linear_kernel(x_ref, w_ref, b_ref, o_ref, *, activation):
    y = jnp.dot(x_ref[...], w_ref[...], preferred_element_type=jnp.float32)
    y = y + b_ref[...]
    if activation == "relu":
        y = jnp.maximum(y, 0.0)
    o_ref[...] = y


def linear(x, w, b=None, activation=None, tile_m=1024):
    m, k = x.shape
    n = w.shape[1]
    if b is None:
        b = jnp.zeros((1, n), jnp.float32)
    tm = min(tile_m, _round_up(m, 8))
    mp = _round_up(m, tm)
    xp = jnp.pad(x, ((0, mp - m), (0, 0))) if mp != m else x
    out = pl.pallas_call(
        functools.partial(_linear_kernel, activation=activation),
        out_shape=jax.ShapeDtypeStruct((mp, n), jnp.float32),
        grid=(mp // tm,),
        in_specs=[pl.BlockSpec((tm, k), lambda i: (i, 0)),
                  pl.BlockSpec((k, n), lambda i: (0, 0)),
                  pl.BlockSpec((1, n), lambda i: (0, 0))],
        out_specs=pl.BlockSpec((tm, n), lambda i: (i, 0)),
        compiler_params=pltpu.CompilerParams(dimension_semantics=("parallel",)),
    )(xp, w, b)
    return out[:m] if mp != m else out


# ------------- fused conv layer (gather + attention + skip + transf + BN) -------------

def _layer_kernel(tgt_ref, src_ref, ea_ref,
                  q_ref, k_ref, v_ref, xr_ref,
                  we_ref, rt_ref, wa_ref, wx_ref,
                  wt_ref, bt_ref, g_ref, b2_ref, mu_ref, var_ref,
                  *rest, heads, ch, add_residual):
    if add_residual:
        res_ref, out_ref, m_sc, l_sc, acc_sc = rest
    else:
        res_ref = None
        out_ref, m_sc, l_sc, acc_sc = rest

    n = q_ref.shape[0]
    t_e = tgt_ref.shape[1]
    t = pl.program_id(0)
    scale = 1.0 / math.sqrt(ch)

    @pl.when(t == 0)
    def _():
        m_sc[...] = jnp.full_like(m_sc, NEG)
        l_sc[...] = jnp.zeros_like(l_sc)
        acc_sc[...] = jnp.zeros_like(acc_sc)

    rt = rt_ref[...]                                                 # [H, HC]

    # One-hot gather/scatter matrices for this edge tile; invalid (padded / pooled-away)
    # edges carry index -1 and therefore match no node -> they contribute nothing.
    node_iota = lax.broadcasted_iota(jnp.int32, (n, t_e), 0)
    oh_tgt = (node_iota == tgt_ref[...]).astype(jnp.float32)         # [N, tE]
    oh_src = (node_iota == src_ref[...]).astype(jnp.float32)         # [N, tE]

    # Fused gathers q[tgt], k[src], v[src] (one-hot matmuls on the MXU) and fused edge
    # projection e = edge_attr @ We added to key & value (no HBM round trips per layer).
    qi = lax.dot_general(oh_tgt, q_ref[...], (((0,), (0,)), ((), ())),
                         preferred_element_type=jnp.float32)         # [tE, HC]
    ks = lax.dot_general(oh_src, k_ref[...], (((0,), (0,)), ((), ())),
                         preferred_element_type=jnp.float32)
    vs = lax.dot_general(oh_src, v_ref[...], (((0,), (0,)), ((), ())),
                         preferred_element_type=jnp.float32)
    e = jnp.dot(ea_ref[...], we_ref[...], preferred_element_type=jnp.float32)
    ke = ks + e
    ve = vs + e

    # Per-edge, per-head attention logits -> [H, tE] (edges on the lane axis).
    logits_t = lax.dot_general(rt, qi * ke, (((1,), (1,)), ((), ())),
                               preferred_element_type=jnp.float32) * scale

    # Per-head 2-D masked max (no rank-3 [N, H, tE] intermediate).
    col_iota = lax.broadcasted_iota(jnp.int32, (1, heads), 1)        # [1, H]
    tile_max = jnp.full((n, heads), NEG, jnp.float32)
    for h in range(heads):
        mh = jnp.max(jnp.where(oh_tgt > 0.0, logits_t[h:h + 1, :], NEG),
                     axis=1, keepdims=True)                          # [N, 1]
        tile_max = jnp.maximum(tile_max, jnp.where(col_iota == h, mh, NEG))

    # Online segment softmax (flash-style running max / denominator / numerator).
    m_old = m_sc[...]
    m_new = jnp.maximum(m_old, tile_max)                             # [N, H]
    corr = jnp.exp(m_old - m_new)                                    # [N, H]

    max_e = lax.dot_general(m_new, oh_tgt, (((0,), (0,)), ((), ())),
                            preferred_element_type=jnp.float32)      # [H, tE]
    # Valid edges always satisfy logits <= max_e; the clamp only neutralizes padded edges.
    p_t = jnp.exp(jnp.minimum(logits_t - max_e, 0.0))                # [H, tE]

    l_sc[...] = corr * l_sc[...] + lax.dot_general(
        oh_tgt, p_t, (((1,), (1,)), ((), ())), preferred_element_type=jnp.float32)

    p_hc = lax.dot_general(p_t, rt, (((0,), (0,)), ((), ())),
                           preferred_element_type=jnp.float32)       # [tE, HC]
    corr_hc = jnp.dot(corr, rt, preferred_element_type=jnp.float32)  # [N, HC]
    acc_sc[...] = corr_hc * acc_sc[...] + jnp.dot(
        oh_tgt, ve * p_hc, preferred_element_type=jnp.float32)       # [N, HC]
    m_sc[...] = m_new

    @pl.when(t == pl.num_programs(0) - 1)
    def _():
        # Exact segment-softmax normalization; the epsilon keeps edgeless nodes at 0.
        inv_l = 1.0 / (l_sc[...] + 1e-16)                            # [N, H]
        agg = acc_sc[...] * jnp.dot(inv_l, rt, preferred_element_type=jnp.float32)
        xr = xr_ref[...]                                             # [N, HC]
        # beta-skip gate (folded weights: agg@(w1+w3) + xr@(w2-w3)).
        blogit = jnp.sum(agg * wa_ref[...] + xr * wx_ref[...], axis=1, keepdims=True)
        beta = 1.0 / (1.0 + jnp.exp(-blogit))
        conv_out = beta * xr + (1.0 - beta) * agg                    # [N, HC]
        # transf Linear + ReLU (lane-padded -> dense 128-lane matmul/store).
        h1 = jnp.dot(conv_out, wt_ref[...], preferred_element_type=jnp.float32) + bt_ref[...]
        h1 = jnp.maximum(h1, 0.0)
        # BatchNorm (eval / running stats) + optional residual.
        y = (h1 - mu_ref[...]) * lax.rsqrt(var_ref[...] + 1e-5) * g_ref[...] + b2_ref[...]
        if add_residual:
            y = y + res_ref[...]
        out_ref[...] = y


def fused_layer(tgt_eff, src_eff, edge_attr_p, q, k, v, xr, we, rt, wa, wx,
                wt, bt, gamma, bbeta, mu, var, residual, heads, ch):
    n, hc = q.shape
    emb_out = wt.shape[1]
    emb_p = _round_up(emb_out, LANE)
    pad = emb_p - emb_out
    e_pad, ef = edge_attr_p.shape
    n_tiles = e_pad // TILE_E
    # Residual added iff shapes match (exactly like the PyTorch `if residual.shape == x.shape`).
    add_res = residual is not None and residual.shape == (n, emb_out)

    # Lane-pad the epilogue parameters so the final matmul/store uses all 128 lanes.
    wt_p = jnp.pad(wt, ((0, 0), (0, pad)))
    bt_p = jnp.pad(bt, ((0, 0), (0, pad)))
    g_p = jnp.pad(gamma, ((0, 0), (0, pad)), constant_values=1.0)
    b2_p = jnp.pad(bbeta, ((0, 0), (0, pad)))
    mu_p = jnp.pad(mu, ((0, 0), (0, pad)))
    var_p = jnp.pad(var, ((0, 0), (0, pad)), constant_values=1.0)

    def resident(shape):
        return pl.BlockSpec(shape, lambda t: (0, 0))

    in_specs = [pl.BlockSpec((1, TILE_E), lambda t: (0, t)),
                pl.BlockSpec((1, TILE_E), lambda t: (0, t)),
                pl.BlockSpec((TILE_E, ef), lambda t: (t, 0)),
                resident((n, hc)), resident((n, hc)), resident((n, hc)), resident((n, hc)),
                resident((ef, hc)), resident((heads, hc)),
                resident((1, hc)), resident((1, hc)),
                resident((hc, emb_p)), resident((1, emb_p)),
                resident((1, emb_p)), resident((1, emb_p)),
                resident((1, emb_p)), resident((1, emb_p))]
    args = [tgt_eff, src_eff, edge_attr_p, q, k, v, xr, we, rt, wa, wx,
            wt_p, bt_p, g_p, b2_p, mu_p, var_p]
    if add_res:
        in_specs.append(resident((n, emb_p)))
        args.append(jnp.pad(residual, ((0, 0), (0, pad))))

    out = pl.pallas_call(
        functools.partial(_layer_kernel, heads=heads, ch=ch, add_residual=add_res),
        out_shape=jax.ShapeDtypeStruct((n, emb_p), jnp.float32),
        grid=(n_tiles,),
        in_specs=in_specs,
        out_specs=resident((n, emb_p)),
        scratch_shapes=[pltpu.VMEM((n, heads), jnp.float32),
                        pltpu.VMEM((n, heads), jnp.float32),
                        pltpu.VMEM((n, hc), jnp.float32)],
        compiler_params=pltpu.CompilerParams(dimension_semantics=("arbitrary",)),
    )(*args)
    return out[:, :emb_out]


# --------------------------- masked global max / sum pooling ---------------------------

def _global_pool_kernel(x_ref, w_ref, max_ref, sum_ref, max_sc, sum_sc):
    t = pl.program_id(0)

    @pl.when(t == 0)
    def _():
        max_sc[...] = jnp.full_like(max_sc, NEG)
        sum_sc[...] = jnp.zeros_like(sum_sc)

    xt = x_ref[...]                                  # [tile_n, D]
    wt = w_ref[...]                                  # [tile_n, B] (batch one-hot * keep)
    sum_sc[...] = sum_sc[...] + lax.dot_general(
        wt, xt, (((0,), (0,)), ((), ())), preferred_element_type=jnp.float32)    # [B, D]

    # Per-graph 2-D masked max (no [tile_n, B, D] intermediate).
    b = max_sc.shape[0]
    row_iota = lax.broadcasted_iota(jnp.int32, (b, 1), 0)
    tile_max = jnp.full(max_sc.shape, NEG, jnp.float32)
    for g in range(b):
        mg = jnp.max(jnp.where(wt[:, g:g + 1] > 0.0, xt, NEG), axis=0, keepdims=True)
        tile_max = jnp.maximum(tile_max, jnp.where(row_iota == g, mg, NEG))
    max_sc[...] = jnp.maximum(max_sc[...], tile_max)

    @pl.when(t == pl.num_programs(0) - 1)
    def _():
        max_ref[...] = max_sc[...]
        sum_ref[...] = sum_sc[...]


def global_pool(x, w_nb):
    n, d = x.shape
    b = w_nb.shape[1]
    tile_n = min(TILE_N_POOL, _round_up(n, 8))
    npad = _round_up(n, tile_n)
    xp = jnp.pad(x, ((0, npad - n), (0, 0))) if npad != n else x
    wp = jnp.pad(w_nb, ((0, npad - n), (0, 0))) if npad != n else w_nb
    mx, sm = pl.pallas_call(
        _global_pool_kernel,
        out_shape=(jax.ShapeDtypeStruct((b, d), jnp.float32),
                   jax.ShapeDtypeStruct((b, d), jnp.float32)),
        grid=(npad // tile_n,),
        in_specs=[pl.BlockSpec((tile_n, d), lambda t: (t, 0)),
                  pl.BlockSpec((tile_n, b), lambda t: (t, 0))],
        out_specs=(pl.BlockSpec((b, d), lambda t: (0, 0)),
                   pl.BlockSpec((b, d), lambda t: (0, 0))),
        scratch_shapes=[pltpu.VMEM((b, d), jnp.float32),
                        pltpu.VMEM((b, d), jnp.float32)],
        compiler_params=pltpu.CompilerParams(dimension_semantics=("arbitrary",)),
    )(xp, wp)
    return mx, sm


# --------------------------- batched on-device TopK pooling ---------------------------

def topk_pool(x, keep, weight, nodes_tbl, valid_tbl, counts, ratio):
    """One batched lax.top_k over a padded [B, max_nodes] per-graph view (no per-graph loop)."""
    n = x.shape[0]
    wn = weight.reshape(-1)
    score = jnp.tanh((x @ wn) / jnp.sqrt(jnp.sum(wn * wn)))                 # [N]
    masked = jnp.where(keep > 0, score, -jnp.inf)
    per_graph = jnp.where(valid_tbl > 0, masked[nodes_tbl], -jnp.inf)       # [B, maxc]
    ks = [int(math.ceil(ratio * c)) for c in counts]                        # static per-graph k
    kmax = max(ks)
    _, loc = lax.top_k(per_graph, kmax)                                     # [B, kmax]
    ks_arr = jnp.asarray(np.asarray(ks, np.int32))
    sel_mask = (lax.broadcasted_iota(jnp.int32, (len(ks), kmax), 1)
                < ks_arr[:, None]).astype(jnp.float32)                      # [B, kmax]
    sel_global = jnp.take_along_axis(nodes_tbl, loc, axis=1)                # [B, kmax]
    new_keep = jnp.zeros((n,), jnp.float32).at[sel_global.reshape(-1)].max(
        sel_mask.reshape(-1))
    x_new = x * score[:, None] * new_keep[:, None]
    return x_new, new_keep, ks


# --------------------------- parameter init ---------------------------

def _uniform(key, shape, bound):
    return jax.random.uniform(key, shape, jnp.float32, minval=-bound, maxval=bound)


def init_linear(key, in_f, out_f, bias=True):
    k1, k2 = jax.random.split(key)
    bound = 1.0 / math.sqrt(in_f)
    w = _uniform(k1, (in_f, out_f), bound)          # y = x @ w + b
    b = _uniform(k2, (1, out_f), bound) if bias else jnp.zeros((1, out_f), jnp.float32)
    return w, b


def init_transformer_conv(key, in_ch, out_ch, heads, edge_dim):
    ks = jax.random.split(key, 6)
    hc = heads * out_ch
    wq, bq = init_linear(ks[0], in_ch, hc)
    wk, bk = init_linear(ks[1], in_ch, hc)
    wv, bv = init_linear(ks[2], in_ch, hc)
    we, _ = init_linear(ks[3], edge_dim, hc, bias=False)
    ws, bs = init_linear(ks[4], in_ch, hc)
    wbeta, _ = init_linear(ks[5], 3 * hc, 1, bias=False)
    w1, w2, w3 = wbeta[:hc], wbeta[hc:2 * hc], wbeta[2 * hc:]
    return dict(
        w_qkvs=jnp.concatenate([wq, wk, wv, ws], axis=1),       # [in, 4*hc] (128 lanes)
        b_qkvs=jnp.concatenate([bq, bk, bv, bs], axis=1),       # [1, 4*hc]
        we=we,                                                   # [edge_dim, hc]
        wa=(w1 + w3).reshape(1, hc),                             # folded beta-gate weights
        wx=(w2 - w3).reshape(1, hc),
    )


def init_bn(d):
    return (jnp.ones((1, d), jnp.float32), jnp.zeros((1, d), jnp.float32),
            jnp.zeros((1, d), jnp.float32), jnp.ones((1, d), jnp.float32))


def init_graph_encoder(key, in_feats, edge_feats, emb, num_layers, n_heads):
    keys = jax.random.split(key, 4 + 4 * num_layers)
    it = iter(keys)
    params = {
        "conv1": init_transformer_conv(next(it), in_feats, emb, n_heads, edge_feats),
        "transf1": init_linear(next(it), emb * n_heads, emb),
        "bn1": init_bn(emb),
        "conv_layers": [], "transf_layers": [], "bn_layers": [], "pool_weights": [],
    }
    for _ in range(num_layers):
        params["conv_layers"].append(
            init_transformer_conv(next(it), emb, emb, n_heads, edge_feats))
        params["transf_layers"].append(init_linear(next(it), emb * n_heads, emb))
        params["bn_layers"].append(init_bn(emb))
        params["pool_weights"].append(_uniform(next(it), (1, emb), 1.0 / math.sqrt(emb)))
    return params


# --------------------------- forward ---------------------------

def graph_encoder_forward(params, x, edge_attr, edge_index, batch_index, *,
                          emb, n_heads, num_layers, top_k_every_n, ratio):
    batch_np = np.asarray(batch_index)
    num_graphs = int(batch_np.max()) + 1
    n_nodes = int(x.shape[0])
    n_pad = _round_up(n_nodes, 8)

    # Static per-graph node tables (host-side graph structure).
    graph_nodes = [np.where(batch_np == g)[0] for g in range(num_graphs)]
    counts = [int(ix.shape[0]) for ix in graph_nodes]
    maxc = max(counts)
    nodes_tbl_np = np.zeros((num_graphs, maxc), np.int32)
    valid_tbl_np = np.zeros((num_graphs, maxc), np.float32)
    for g, ix in enumerate(graph_nodes):
        nodes_tbl_np[g, :ix.shape[0]] = ix
        valid_tbl_np[g, :ix.shape[0]] = 1.0
    nodes_tbl = jnp.asarray(nodes_tbl_np)
    valid_tbl = jnp.asarray(valid_tbl_np)

    batch_w_np = np.zeros((n_pad, num_graphs), np.float32)
    batch_w_np[np.arange(n_nodes), batch_np] = 1.0
    batch_w_nb = jnp.asarray(batch_w_np)                         # [N_pad, B]

    # Pad edges once to a multiple of TILE_E; padded edges are marked invalid.
    n_edges = int(edge_index.shape[1])
    e_pad = _round_up(max(n_edges, 1), TILE_E)
    src_np = np.zeros(e_pad, np.int32)
    tgt_np = np.zeros(e_pad, np.int32)
    src_np[:n_edges] = np.asarray(edge_index)[0]
    tgt_np[:n_edges] = np.asarray(edge_index)[1]
    ev_np = np.zeros(e_pad, np.float32)
    ev_np[:n_edges] = 1.0
    ea_np = np.zeros((e_pad, edge_attr.shape[1]), np.float32)
    ea_np[:n_edges] = np.asarray(edge_attr)
    src = jnp.asarray(src_np)
    tgt = jnp.asarray(tgt_np)
    edge_valid = jnp.asarray(ev_np)
    edge_attr_p = jnp.asarray(ea_np)

    keep_np = np.zeros(n_pad, np.float32)
    keep_np[:n_nodes] = 1.0
    keep = jnp.asarray(keep_np)

    hc = n_heads * emb
    rt = jnp.asarray((np.arange(hc)[None, :] // emb
                      == np.arange(n_heads)[:, None]).astype(np.float32))    # [H, HC]

    x = jnp.asarray(x, jnp.float32)
    if n_pad != n_nodes:
        x = jnp.pad(x, ((0, n_pad - n_nodes), (0, 0)))

    def layer(p_conv, p_transf, p_bn, x_in, residual, edge_valid):
        proj = linear(x_in, p_conv["w_qkvs"], p_conv["b_qkvs"])              # [N, 4*hc]
        q = proj[:, 0 * hc:1 * hc]
        k = proj[:, 1 * hc:2 * hc]
        v = proj[:, 2 * hc:3 * hc]
        xr = proj[:, 3 * hc:4 * hc]
        tgt_eff = jnp.where(edge_valid > 0, tgt, -1).astype(jnp.int32).reshape(1, e_pad)
        src_eff = jnp.where(edge_valid > 0, src, -1).astype(jnp.int32).reshape(1, e_pad)
        wt, bt = p_transf
        gamma, bb, mu, var = p_bn
        return fused_layer(tgt_eff, src_eff, edge_attr_p, q, k, v, xr,
                           p_conv["we"], rt, p_conv["wa"], p_conv["wx"],
                           wt, bt, gamma, bb, mu, var, residual, n_heads, emb)

    residual = x
    x = layer(params["conv1"], params["transf1"], params["bn1"], x, residual, edge_valid)

    global_representation = []
    for i in range(num_layers):
        residual = x
        x = layer(params["conv_layers"][i], params["transf_layers"][i],
                  params["bn_layers"][i], x, residual, edge_valid)
        if i % top_k_every_n == 0 or i == num_layers - 1:
            x, keep, counts = topk_pool(x, keep, params["pool_weights"][i],
                                        nodes_tbl, valid_tbl, counts, ratio)
            edge_valid = edge_valid * jnp.take(keep, src) * jnp.take(keep, tgt)
            w_nb = batch_w_nb * keep[:, None]                                # [N, B]
            cnt = jnp.sum(w_nb, axis=0)                                      # [B]
            mx, sm = global_pool(x, w_nb)
            mean = sm / jnp.maximum(cnt, 1.0)[:, None]
            global_representation.append(jnp.concatenate([mx, mean], axis=1))
    return sum(global_representation)


# --------------------------- main ---------------------------

if __name__ == "__main__":
    in_feats, edge_feats, emb, n_heads = 8, 4, 8, 4
    num_layers, top_k_every_n, ratio = 3, 3, 0.5
    num_graphs, nodes_per_graph = 2, 40
    n_nodes = num_graphs * nodes_per_graph

    # Bidirectional ring graphs per graph.
    src_l, tgt_l = [], []
    for g in range(num_graphs):
        base = g * nodes_per_graph
        for u in range(nodes_per_graph):
            v = (u + 1) % nodes_per_graph
            src_l += [base + u, base + v]
            tgt_l += [base + v, base + u]
    edge_index = np.array([src_l, tgt_l], dtype=np.int32)                    # [2, E]
    batch_index = np.repeat(np.arange(num_graphs), nodes_per_graph).astype(np.int32)

    key = jax.random.PRNGKey(0)
    kx, ke, kp = jax.random.split(key, 3)
    x = jax.random.normal(kx, (n_nodes, in_feats), jnp.float32)
    edge_attr = jax.random.normal(ke, (edge_index.shape[1], edge_feats), jnp.float32)

    params = init_graph_encoder(kp, in_feats, edge_feats, emb, num_layers, n_heads)

    out = graph_encoder_forward(
        params, x, edge_attr, edge_index, batch_index,
        emb=emb, n_heads=n_heads, num_layers=num_layers,
        top_k_every_n=top_k_every_n, ratio=ratio)
    out = jax.block_until_ready(out)

    assert out.shape == (num_graphs, 2 * emb), out.shape
    assert bool(jnp.all(jnp.isfinite(out)))
    print("KERNEL_OK")
</pallas_src>

<mosaic_0001>
module attributes {stable_mosaic.version = 11 : i64} {
  func.func @_linear_kernel(%arg0: i32, %arg1: memref<80x8xf32, #tpu.memory_space<vmem>>, %arg2: memref<8x128xf32, #tpu.memory_space<vmem>>, %arg3: memref<1x128xf32, #tpu.memory_space<vmem>>, %arg4: memref<80x128xf32, #tpu.memory_space<vmem>>) attributes {dimension_semantics = [#tpu.dimension_semantics<parallel>], iteration_bounds = array<i64: 1>, scalar_prefetch = 0 : i64, scratch_operands = 0 : i64, tpu.core_type = #tpu.core_type<tc>, window_params = [{transform_indices = @transform_0, window_bounds = array<i64: 80, 8>}, {pipeline_mode = #tpu.pipeline_mode<synchronous>, transform_indices = @transform_1, window_bounds = array<i64: 8, 128>}, {pipeline_mode = #tpu.pipeline_mode<synchronous>, transform_indices = @transform_2, window_bounds = array<i64: 1, 128>}, {transform_indices = @transform_3, window_bounds = array<i64: 80, 128>}]} {
    %c0 = arith.constant 0 : index
    %c0_0 = arith.constant 0 : index
    %0 = vector.load %arg1[%c0, %c0_0] : memref<80x8xf32, #tpu.memory_space<vmem>>, vector<80x8xf32>
    %c0_1 = arith.constant 0 : index
    %c0_2 = arith.constant 0 : index
    %1 = vector.load %arg2[%c0_1, %c0_2] : memref<8x128xf32, #tpu.memory_space<vmem>>, vector<8x128xf32>
    %cst = arith.constant dense<0.000000e+00> : vector<80x128xf32>
    %2 = tpu.matmul %0, %1, %cst {dimension_numbers = #tpu.dot_dimension_numbers<[1], [0], [0], [1], [0, 0, 1, 1], [], []>} : vector<80x8xf32>, vector<8x128xf32>, vector<80x128xf32> -> vector<80x128xf32>
    %c0_3 = arith.constant 0 : index
    %c0_4 = arith.constant 0 : index
    %3 = vector.load %arg3[%c0_3, %c0_4] : memref<1x128xf32, #tpu.memory_space<vmem>>, vector<1x128xf32>
    %4 = vector.broadcast %3 : vector<1x128xf32> to vector<80x128xf32>
    %5 = arith.addf %2, %4 : vector<80x128xf32>
    %c0_5 = arith.constant 0 : index
    %c0_6 = arith.constant 0 : index
    %6 = vector.load %arg4[%c0_5, %c0_6] : memref<80x128xf32, #tpu.memory_space<vmem>>, vector<80x128xf32>
    tpu.vector_store %arg4[%c0_5, %c0_6], %5 {strides = array<i32>} : memref<80x128xf32, #tpu.memory_space<vmem>>, vector<80x128xf32>,
    return
  }
  func.func @transform_0(%arg0: i32) -> (i32, i32) {
    %c0_i32 = arith.constant 0 : i32
    %c0_i32_0 = arith.constant 0 : i32
    return %arg0, %c0_i32 : i32, i32
  }
  func.func @transform_1(%arg0: i32) -> (i32, i32) {
    %c0_i32 = arith.constant 0 : i32
    %c0_i32_0 = arith.constant 0 : i32
    %c0_i32_1 = arith.constant 0 : i32
    return %c0_i32, %c0_i32_0 : i32, i32
  }
  func.func @transform_2(%arg0: i32) -> (i32, i32) {
    %c0_i32 = arith.constant 0 : i32
    %c0_i32_0 = arith.constant 0 : i32
    %c0_i32_1 = arith.constant 0 : i32
    return %c0_i32, %c0_i32_0 : i32, i32
  }
  func.func @transform_3(%arg0: i32) -> (i32, i32) {
    %c0_i32 = arith.constant 0 : i32
    %c0_i32_0 = arith.constant 0 : i32
    return %arg0, %c0_i32 : i32, i32
  }
}

</mosaic_0001>

<bundles_post_ra>
// kernel: tpu_custom_call.1
= control target key start
LH: loop header
LB: loop body
LE: loop exit
PB: predicated region body
PF: predicated region fallthrough
CT: control target
= control target key end

     0   :  { %vm33_vm0 = vcmask 64512   ;;  %s343_s0 = inlined_call_operand.vmem [shape: f32[80,8], index: 0, kind: input, shape index: {}]   ;;  %s344_s1 = inlined_call_operand.vmem [shape: f32[8,128], index: 1, kind: input, shape index: {}]   ;;  %s345_s2 = inlined_call_operand.vmem [shape: f32[1,128], index: 2, kind: input, shape index: {}]   ;;  %s346_s3 = inlined_call_operand.hbm [shape: f32[80,128], index: 3, kind: output, shape index: {}]  }
   0x1   :  { %v25_v0 = vld [vmem:[%s344_s1] sm:$0xff]  ;;  %v16_v2 = vld [vmem:[%s343_s0 + $0x8] sm:$0xff]  ;;  %v21_v3 = vld [vmem:[%s343_s0 + $0x30] sm:$0xff] }
   0x2   :  { %v15_v1 = vld [vmem:[%s343_s0] sm:$0xff]  ;;  %227 = vmatprep.subr.mxu0 %v25_v0  ;;  %v17_v4 = vld [vmem:[%s343_s0 + $0x10] sm:$0xff]  ;;  %244 = vmatprep.subr.mxu1 %v25_v0  ;;  %v22_v5 = vld [vmem:[%s343_s0 + $0x38] sm:$0xff] }
   0x3   :  { %229 = vmatprep.mubr.msk.f32.mxu0 %vm33_vm0, %v15_v1  ;;  %228 = vmatpush3.msra.mxu0 %v25_v0  ;;  %v23_v6 = vld [vmem:[%s343_s0 + $0x40] sm:$0xff] }
   0x4   :  { %230 = vmatmul.mubr.msk.f32.vlgmr.msra.gmra.mxu0 %vm33_vm0, %v16_v2  ;;  %245 = vmatpush3.msra.mxu1 %v25_v0 }
   0x5   :  { %8 = vsyncpa [#allocation3], 0  ;;  %238 = vmatprep.mubr.msk.f32.mxu1 %vm33_vm0, %v21_v3  ;;  %232 = vmatprep.mubr.msk.f32.mxu0 %vm33_vm0, %v17_v4  ;;  %v18_v7 = vld [vmem:[%s343_s0 + $0x18] sm:$0xff]  ;;  %v19_v8 = vld [vmem:[%s343_s0 + $0x20] sm:$0xff] }
   0x6   :  { %239 = vmatmul.mubr.msk.f32.vlgmr.msra.gmra.mxu1 %vm33_vm0, %v22_v5  ;;  %v24_v9 = vld [vmem:[%s343_s0 + $0x48] sm:$0xff]  ;;  %v205_v11 = vld [vmem:[%s345_s2] ss:$0 sm:$0xff] }
   0x7   :  { %241 = vmatprep.mubr.msk.f32.mxu1 %vm33_vm0, %v23_v6  ;;  %v20_v10 = vld [vmem:[%s343_s0 + $0x28] sm:$0xff]  ;;  %s271_s0 = smov [#allocation2]  }
   0x8   :  { %233 = vmatmul.mubr.msk.f32.gmra.mxu0 %vm33_vm0, %v18_v7  ;;  %s194_s2 = sshll.u32 %s271_s0, 4  ;;  %s195_s2 = int_to_ptr.vmem [resolvable:$true] %s194_s2 }
   0x9   :  { %235 = vmatprep.mubr.msk.f32.mxu0 %vm33_vm0, %v19_v8  ;;  %s249_s8 = scalar_lea.vmem %s195_s2, 1280  ;;  %p254_p1 = scmp.lt.s32.totalorder %s195_s2, %s195_s2 }
   0xa   :  { %242 = vmatmul.mubr.msk.f32.gmra.mxu1 %vm33_vm0, %v24_v9  ;;  %p250_p0 = scmp.ne.s32.totalorder %s195_s2, %s249_s8  ;;  %p255_p2 = scmp.lt.s32.totalorder %s249_s8, %s249_s8 }
   0xc   :  { %236 = vmatmul.mubr.msk.f32.gmra.mxu0 %vm33_vm0, %v20_v10  ;;  %p256_p3 = por %p255_p2, %p254_p1 }
   0xe   :  { %p257_p4 = pnand %p256_p3, %p250_p0 }
  0xc4   :  { %v231_v12 = vpop.f32.mrf.mxu0 }
  0xc5   :  { %v136_v13 = vadd.f32 %v231_v12, %v205_v11 }
  0xc6   :  { %v130_v14 = vpop.f32.mrf.mxu0  ;;  %v240_v15 = vpop.f32.mrf.mxu1 }
  0xc7   :  { %180 = vst [vmem:[#allocation2 + $0x8] sm:$0xff] %v136_v13  ;;  %v131_v16 = vadd.f32 %v205_v11, %v130_v14  ;;  %v166_v17 = vadd.f32 %v240_v15, %v205_v11 }
  0xc8   :  { %v234_v18 = vpop.f32.mrf.mxu0  ;;  %v160_v19 = vpop.f32.mrf.mxu1 }
  0xc9   :  { %179 = vst [vmem:[#allocation2] sm:$0xff] %v131_v16  ;;  %186 = vst [vmem:[#allocation2 + $0x38] sm:$0xff] %v166_v17  ;;  %v146_v20 = vadd.f32 %v234_v18, %v205_v11  ;;  %v161_v21 = vadd.f32 %v205_v11, %v160_v19 }
  0xca   :  { %v140_v22 = vpop.f32.mrf.mxu0  ;;  %v243_v23 = vpop.f32.mrf.mxu1 }
  0xcb   :  { %182 = vst [vmem:[#allocation2 + $0x18] sm:$0xff] %v146_v20  ;;  %185 = vst [vmem:[#allocation2 + $0x30] sm:$0xff] %v161_v21  ;;  %v141_v24 = vadd.f32 %v205_v11, %v140_v22  ;;  %v176_v25 = vadd.f32 %v243_v23, %v205_v11 }
  0xcc   :  { %v237_v26 = vpop.f32.mrf.mxu0  ;;  %v170_v27 = vpop.f32.mrf.mxu1 }
  0xcd   :  { %181 = vst [vmem:[#allocation2 + $0x10] sm:$0xff] %v141_v24  ;;  %188 = vst [vmem:[#allocation2 + $0x48] sm:$0xff] %v176_v25  ;;  %v156_v28 = vadd.f32 %v237_v26, %v205_v11  ;;  %v171_v29 = vadd.f32 %v205_v11, %v170_v27 }
  0xce   :  { %v150_v30 = vpop.f32.mrf.mxu0 }
  0xcf   :  { %184 = vst [vmem:[#allocation2 + $0x28] sm:$0xff] %v156_v28  ;;  %187 = vst [vmem:[#allocation2 + $0x40] sm:$0xff] %v171_v29  ;;  %v151_v31 = vadd.f32 %v205_v11, %v150_v30 }
  0xd1   :  { %183 = vst [vmem:[#allocation2 + $0x20] sm:$0xff] %v151_v31 }
  0xd2   :  { %260 = shalt.err (!%p257_p4)
}
  0xd3   :  { %s272_s9 = smov 128   ;;  %s273_s10 = smov 8  }
  0xd4   :  { %200 = dma.vmem_to_hbm [thread:$0]  %s195_s2, 1280, %s346_s3, [#allocation3], %s272_s9, %s272_s9, %s273_s10  }
  0xd5   :  { %269 = dma.done.wait [#allocation3], 1280  }
  0xd6   :  { %270 = vsyncadd [#allocation3], 4294966016 }
  0xd7   :  { %204 = vsyncpa [#allocation3], 1 }

</bundles_post_ra>
